<compile_context>
chip_gen: v7x
topology: tpu7x:2x2x1
jax: 0.10.0
libtpu: 0.0.40
codegen_flags: <defaults>
</compile_context>

<pallas_src>
import math

import jax
import jax.numpy as jnp
import numpy as np
from jax import lax
from jax.experimental import pallas as pl
from jax.experimental.pallas import tpu as pltpu


def _round_up(x, m):
    return ((x + m - 1) // m) * m


# ----------------------------------------------------------------------------
# Pallas kernel factory: one DenseBlock layer (gated dilated causal conv).
#   pre = sum_i  slab_i[t-d] @ Wa_i  +  slab_i[t] @ Wb_i   + bias      (N = 2*Fp)
#   out = tanh(pre[:, :Fp]) * sigmoid(pre[:, Fp:])
# ----------------------------------------------------------------------------
def _make_layer_kernel(n_slabs, dilation, T, Dpad, block_b, Fp):
    two_fp = 2 * Fp

    def kernel(*refs):
        slab_refs = refs[:n_slabs]
        wa_refs = refs[n_slabs:2 * n_slabs]          # tap at t - d
        wb_refs = refs[2 * n_slabs:3 * n_slabs]      # tap at t
        b_ref = refs[3 * n_slabs]
        out_ref = refs[3 * n_slabs + 1]

        bias = b_ref[...]                            # (1, 2*Fp)

        # Static unroll over the batch rows of this block; each iteration is a
        # (T, P) x (P, 2*Fp) MXU matmul per slab per tap.
        for j in range(block_b):
            acc = jnp.zeros((T, two_fp), jnp.float32)
            for i in range(n_slabs):
                cur = slab_refs[i][j, Dpad:Dpad + T, :]                         # x[t]
                prev = slab_refs[i][j, Dpad - dilation:Dpad - dilation + T, :]  # x[t-d]
                acc = acc + jnp.dot(prev, wa_refs[i][...],
                                    preferred_element_type=jnp.float32)
                acc = acc + jnp.dot(cur, wb_refs[i][...],
                                    preferred_element_type=jnp.float32)
            acc = acc + bias
            gate = jnp.tanh(acc[:, :Fp]) * jax.nn.sigmoid(acc[:, Fp:])
            # Keep the causal-pad rows of the new slab zero so the next layer's
            # shifted tap reads zeros for t < d (and the pad lanes are already
            # exactly zero because their weight columns / bias are zero).
            out_ref[j, :Dpad, :] = jnp.zeros((Dpad, Fp), jnp.float32)
            out_ref[j, Dpad:Dpad + T, :] = gate

    return kernel


def _dense_layer(slabs, Was, Wbs, bias, dilation, T, Dpad, Fp, block_b):
    B = slabs[0].shape[0]
    Tp = Dpad + T
    n = len(slabs)
    widths = [int(s.shape[-1]) for s in slabs]

    in_specs = []
    for P_i in widths:                                   # activation slabs: tiled over batch
        in_specs.append(pl.BlockSpec((block_b, Tp, P_i), lambda b: (b, 0, 0)))
    for P_i in widths:                                   # Wa_i: resident, full extent
        in_specs.append(pl.BlockSpec((P_i, 2 * Fp), lambda b: (0, 0)))
    for P_i in widths:                                   # Wb_i
        in_specs.append(pl.BlockSpec((P_i, 2 * Fp), lambda b: (0, 0)))
    in_specs.append(pl.BlockSpec((1, 2 * Fp), lambda b: (0, 0)))   # fused bias

    out_spec = pl.BlockSpec((block_b, Tp, Fp), lambda b: (b, 0, 0))

    kernel = _make_layer_kernel(n, dilation, T, Dpad, block_b, Fp)
    return pl.pallas_call(
        kernel,
        grid=(pl.cdiv(B, block_b),),
        in_specs=in_specs,
        out_specs=out_spec,
        out_shape=jax.ShapeDtypeStruct((B, Tp, Fp), jnp.float32),
        compiler_params=pltpu.CompilerParams(
            dimension_semantics=("parallel",)),          # shard row tiles across TCs (v7x)
    )(*slabs, *Was, *Wbs, bias)


# ----------------------------------------------------------------------------
# Parameters: raw (PyTorch Conv1d style) init + one-time kernel-layout preparation.
# ----------------------------------------------------------------------------
def init_tcblock_params(key, in_channels, filters, seq_len):
    layer_count = math.ceil(math.log(seq_len) / math.log(2))
    params = []
    c = in_channels
    for layer in range(layer_count):
        d = 2 ** layer
        bound = 1.0 / math.sqrt(c * 2)   # fan_in = in_ch * kernel_size
        key, k1, k2, k3, k4 = jax.random.split(key, 5)
        w1 = jax.random.uniform(k1, (filters, c, 2), jnp.float32, -bound, bound)
        b1 = jax.random.uniform(k2, (filters,), jnp.float32, -bound, bound)
        w2 = jax.random.uniform(k3, (filters, c, 2), jnp.float32, -bound, bound)
        b2 = jax.random.uniform(k4, (filters,), jnp.float32, -bound, bound)
        params.append((d, w1, b1, w2, b2))
        c += filters
    return params


def prepare_tcblock(params, in_channels, filters):
    """One-time prep: split conv weights per slab, transpose to (C, F), fuse the
    tanh/sigmoid branches along N ([conv1 | conv2] -> 2*Fp columns), zero-pad to
    lane-dense shapes.  Hoisted out of the forward pass."""
    Fp = _round_up(filters, 128)
    P0 = _round_up(in_channels, 128)
    layers = []
    for layer_idx, (d, w1, b1, w2, b2) in enumerate(params):
        n = layer_idx + 1                    # number of input slabs for this layer
        Was, Wbs = [], []
        lo = 0
        for i in range(n):
            c_i = in_channels if i == 0 else filters
            P_i = P0 if i == 0 else Fp
            hi = lo + c_i
            # PyTorch Conv1d weight is (out_ch, in_ch, k); tap 0 sees t-d, tap 1 sees t.
            wa = jnp.zeros((P_i, 2 * Fp), jnp.float32)
            wa = wa.at[:c_i, :filters].set(jnp.transpose(w1[:, lo:hi, 0]))
            wa = wa.at[:c_i, Fp:Fp + filters].set(jnp.transpose(w2[:, lo:hi, 0]))
            wb = jnp.zeros((P_i, 2 * Fp), jnp.float32)
            wb = wb.at[:c_i, :filters].set(jnp.transpose(w1[:, lo:hi, 1]))
            wb = wb.at[:c_i, Fp:Fp + filters].set(jnp.transpose(w2[:, lo:hi, 1]))
            Was.append(wa)
            Wbs.append(wb)
            lo = hi
        bias = jnp.zeros((1, 2 * Fp), jnp.float32)
        bias = bias.at[0, :filters].set(b1).at[0, Fp:Fp + filters].set(b2)
        layers.append((d, Was, Wbs, bias))
    return {"layers": layers, "in_channels": in_channels, "filters": filters,
            "P0": P0, "Fp": Fp}


# ----------------------------------------------------------------------------
# Forward pass.
# ----------------------------------------------------------------------------
def tcblock_forward(x_nct, prepped, block_batch=None):
    """x_nct: (B, C_in, T) float32 in PyTorch Conv1d layout.
    Returns (B, C_in + L*filters, T)."""
    B, C_in, T = x_nct.shape
    layers = prepped["layers"]
    filters = prepped["filters"]
    P0, Fp = prepped["P0"], prepped["Fp"]
    if not layers:
        return x_nct

    d_max = max(l[0] for l in layers)
    Dpad = max(8, _round_up(d_max, 8))       # 8-aligned causal pad rows
    Tp = Dpad + T

    if block_batch is None:
        # Target ~512 real rows (= block_batch * T) per grid step.
        block_batch = min(B, max(1, 512 // max(T, 1)))
    block_batch = max(1, min(block_batch, B))

    # Slab 0: input, channels-last, lane-padded, with Dpad leading zero rows.
    x_btc = jnp.transpose(x_nct, (0, 2, 1)).astype(jnp.float32)
    slab0 = jnp.zeros((B, Tp, P0), jnp.float32)
    slab0 = slab0.at[:, Dpad:, :C_in].set(x_btc)

    slabs = [slab0]
    for (d, Was, Wbs, bias) in layers:
        new_slab = _dense_layer(slabs, Was, Wbs, bias, d, T, Dpad, Fp, block_batch)
        slabs.append(new_slab)               # DenseBlock "concat" without HBM rewrite

    # Final assembly (single pass): [input, g_0, ..., g_{L-1}] back to NCT.
    parts = [x_nct]
    for s in slabs[1:]:
        parts.append(jnp.transpose(s[:, Dpad:Dpad + T, :filters], (0, 2, 1)))
    return jnp.concatenate(parts, axis=1)


# ----------------------------------------------------------------------------
# Pure-JAX reference (lax.conv_general_dilated, mirrors PyTorch semantics).
# ----------------------------------------------------------------------------
def _causal_conv_ref(x_nct, w, b, d):
    y = lax.conv_general_dilated(
        x_nct, w, window_strides=(1,), padding=[(d, d)],
        rhs_dilation=(d,), dimension_numbers=('NCH', 'OIH', 'NCH'))
    y = y + b[None, :, None]
    return y[:, :, :-d]


def tcblock_forward_ref(x_nct, params):
    x = x_nct
    for (d, w1, b1, w2, b2) in params:
        t = jnp.tanh(_causal_conv_ref(x, w1, b1, d))
        s = jax.nn.sigmoid(_causal_conv_ref(x, w2, b2, d))
        x = jnp.concatenate([x, t * s], axis=1)
    return x


if __name__ == "__main__":
    B, C_in, T = 4, 4, 16          # seq_len = 16 -> 4 DenseBlock layers (dil 1, 2, 4, 8)
    filters = 8

    key = jax.random.PRNGKey(0)
    kx, kp = jax.random.split(key)
    x = jax.random.normal(kx, (B, C_in, T), jnp.float32)   # NCT, like PyTorch Conv1d

    params = init_tcblock_params(kp, C_in, filters, T)
    prepped = prepare_tcblock(params, C_in, filters)        # one-time weight prep

    # block_batch=2 -> grid of 2 row tiles per layer (exercises the pipelined path).
    out = tcblock_forward(x, prepped, block_batch=2)
    out = jax.block_until_ready(out)

    ref = jax.block_until_ready(tcblock_forward_ref(x, params))

    expected_channels = C_in + math.ceil(math.log2(T)) * filters
    assert out.shape == (B, expected_channels, T), out.shape
    assert np.allclose(np.asarray(out), np.asarray(ref), rtol=1e-4, atol=1e-5), \
        "Pallas TCBlock mismatch vs reference"

    print("KERNEL_OK")
</pallas_src>

<mosaic_0001>
module attributes {stable_mosaic.version = 11 : i64} {
  func.func @kernel(%arg0: i32, %arg1: memref<2x24x128xf32, #tpu.memory_space<vmem>>, %arg2: memref<128x256xf32, #tpu.memory_space<vmem>>, %arg3: memref<128x256xf32, #tpu.memory_space<vmem>>, %arg4: memref<1x256xf32, #tpu.memory_space<vmem>>, %arg5: memref<2x24x128xf32, #tpu.memory_space<vmem>>) attributes {dimension_semantics = [#tpu.dimension_semantics<parallel>], iteration_bounds = array<i64: 2>, scalar_prefetch = 0 : i64, scratch_operands = 0 : i64, tpu.core_type = #tpu.core_type<tc>, window_params = [{transform_indices = @transform_0, window_bounds = array<i64: 2, 24, 128>}, {pipeline_mode = #tpu.pipeline_mode<synchronous>, transform_indices = @transform_1, window_bounds = array<i64: 128, 256>}, {pipeline_mode = #tpu.pipeline_mode<synchronous>, transform_indices = @transform_2, window_bounds = array<i64: 128, 256>}, {pipeline_mode = #tpu.pipeline_mode<synchronous>, transform_indices = @transform_3, window_bounds = array<i64: 1, 256>}, {transform_indices = @transform_4, window_bounds = array<i64: 2, 24, 128>}]} {
    %c0 = arith.constant 0 : index
    %c0_0 = arith.constant 0 : index
    %0 = vector.load %arg4[%c0, %c0_0] : memref<1x256xf32, #tpu.memory_space<vmem>>, vector<1x256xf32>
    %cst = arith.constant 0.000000e+00 : f32
    %1 = vector.broadcast %cst : f32 to vector<16x256xf32>
    %c0_1 = arith.constant 0 : index
    %c8 = arith.constant 8 : index
    %c0_2 = arith.constant 0 : index
    %2 = vector.load %arg1[%c0_1, %c8, %c0_2] : memref<2x24x128xf32, #tpu.memory_space<vmem>>, vector<1x16x128xf32>
    %3 = vector.shape_cast %2 : vector<1x16x128xf32> to vector<16x128xf32>
    %c0_3 = arith.constant 0 : index
    %c7 = arith.constant 7 : index
    %c0_4 = arith.constant 0 : index
    %4 = vector.load %arg1[%c0_3, %c7, %c0_4] : memref<2x24x128xf32, #tpu.memory_space<vmem>>, vector<1x16x128xf32>
    %5 = vector.shape_cast %4 : vector<1x16x128xf32> to vector<16x128xf32>
    %c0_5 = arith.constant 0 : index
    %c0_6 = arith.constant 0 : index
    %6 = vector.load %arg2[%c0_5, %c0_6] : memref<128x256xf32, #tpu.memory_space<vmem>>, vector<128x256xf32>
    %cst_7 = arith.constant dense<0.000000e+00> : vector<16x256xf32>
    %7 = tpu.matmul %5, %6, %cst_7 {dimension_numbers = #tpu.dot_dimension_numbers<[1], [0], [0], [1], [0, 0, 1, 1], [], []>} : vector<16x128xf32>, vector<128x256xf32>, vector<16x256xf32> -> vector<16x256xf32>
    %8 = arith.addf %1, %7 : vector<16x256xf32>
    %c0_8 = arith.constant 0 : index
    %c0_9 = arith.constant 0 : index
    %9 = vector.load %arg3[%c0_8, %c0_9] : memref<128x256xf32, #tpu.memory_space<vmem>>, vector<128x256xf32>
    %cst_10 = arith.constant dense<0.000000e+00> : vector<16x256xf32>
    %10 = tpu.matmul %3, %9, %cst_10 {dimension_numbers = #tpu.dot_dimension_numbers<[1], [0], [0], [1], [0, 0, 1, 1], [], []>} : vector<16x128xf32>, vector<128x256xf32>, vector<16x256xf32> -> vector<16x256xf32>
    %11 = arith.addf %8, %10 : vector<16x256xf32>
    %12 = vector.broadcast %0 : vector<1x256xf32> to vector<16x256xf32>
    %13 = arith.addf %11, %12 : vector<16x256xf32>
    %14 = vector.extract_strided_slice %13 {offsets = [0, 0], sizes = [16, 128], strides = [1, 1]} : vector<16x256xf32> to vector<16x128xf32>
    %15 = math.tanh %14 : vector<16x128xf32>
    %16 = vector.extract_strided_slice %13 {offsets = [0, 128], sizes = [16, 128], strides = [1, 1]} : vector<16x256xf32> to vector<16x128xf32>
    %17 = arith.negf %16 : vector<16x128xf32>
    %18 = math.exp %17 : vector<16x128xf32>
    %cst_11 = arith.constant 1.000000e+00 : f32
    %19 = vector.broadcast %cst_11 : f32 to vector<16x128xf32>
    %20 = arith.addf %19, %18 : vector<16x128xf32>
    %21 = arith.divf %19, %20 : vector<16x128xf32>
    %22 = arith.mulf %15, %21 : vector<16x128xf32>
    %cst_12 = arith.constant 0.000000e+00 : f32
    %23 = vector.broadcast %cst_12 : f32 to vector<8x128xf32>
    %c0_13 = arith.constant 0 : index
    %c0_14 = arith.constant 0 : index
    %c0_15 = arith.constant 0 : index
    %24 = vector.load %arg5[%c0_13, %c0_14, %c0_15] : memref<2x24x128xf32, #tpu.memory_space<vmem>>, vector<1x8x128xf32>
    %25 = vector.shape_cast %24 : vector<1x8x128xf32> to vector<8x128xf32>
    %26 = vector.shape_cast %23 : vector<8x128xf32> to vector<1x8x128xf32>
    tpu.vector_store %arg5[%c0_13, %c0_14, %c0_15], %26 {strides = array<i32>} : memref<2x24x128xf32, #tpu.memory_space<vmem>>, vector<1x8x128xf32>,
    %c0_16 = arith.constant 0 : index
    %c8_17 = arith.constant 8 : index
    %c0_18 = arith.constant 0 : index
    %27 = vector.load %arg5[%c0_16, %c8_17, %c0_18] : memref<2x24x128xf32, #tpu.memory_space<vmem>>, vector<1x16x128xf32>
    %28 = vector.shape_cast %27 : vector<1x16x128xf32> to vector<16x128xf32>
    %29 = vector.shape_cast %22 : vector<16x128xf32> to vector<1x16x128xf32>
    tpu.vector_store %arg5[%c0_16, %c8_17, %c0_18], %29 {strides = array<i32>} : memref<2x24x128xf32, #tpu.memory_space<vmem>>, vector<1x16x128xf32>,
    %cst_19 = arith.constant 0.000000e+00 : f32
    %30 = vector.broadcast %cst_19 : f32 to vector<16x256xf32>
    %c1 = arith.constant 1 : index
    %c8_20 = arith.constant 8 : index
    %c0_21 = arith.constant 0 : index
    %31 = vector.load %arg1[%c1, %c8_20, %c0_21] : memref<2x24x128xf32, #tpu.memory_space<vmem>>, vector<1x16x128xf32>
    %32 = vector.shape_cast %31 : vector<1x16x128xf32> to vector<16x128xf32>
    %c1_22 = arith.constant 1 : index
    %c7_23 = arith.constant 7 : index
    %c0_24 = arith.constant 0 : index
    %33 = vector.load %arg1[%c1_22, %c7_23, %c0_24] : memref<2x24x128xf32, #tpu.memory_space<vmem>>, vector<1x16x128xf32>
    %34 = vector.shape_cast %33 : vector<1x16x128xf32> to vector<16x128xf32>
    %c0_25 = arith.constant 0 : index
    %c0_26 = arith.constant 0 : index
    %35 = vector.load %arg2[%c0_25, %c0_26] : memref<128x256xf32, #tpu.memory_space<vmem>>, vector<128x256xf32>
    %cst_27 = arith.constant dense<0.000000e+00> : vector<16x256xf32>
    %36 = tpu.matmul %34, %35, %cst_27 {dimension_numbers = #tpu.dot_dimension_numbers<[1], [0], [0], [1], [0, 0, 1, 1], [], []>} : vector<16x128xf32>, vector<128x256xf32>, vector<16x256xf32> -> vector<16x256xf32>
    %37 = arith.addf %30, %36 : vector<16x256xf32>
    %c0_28 = arith.constant 0 : index
    %c0_29 = arith.constant 0 : index
    %38 = vector.load %arg3[%c0_28, %c0_29] : memref<128x256xf32, #tpu.memory_space<vmem>>, vector<128x256xf32>
    %cst_30 = arith.constant dense<0.000000e+00> : vector<16x256xf32>
    %39 = tpu.matmul %32, %38, %cst_30 {dimension_numbers = #tpu.dot_dimension_numbers<[1], [0], [0], [1], [0, 0, 1, 1], [], []>} : vector<16x128xf32>, vector<128x256xf32>, vector<16x256xf32> -> vector<16x256xf32>
    %40 = arith.addf %37, %39 : vector<16x256xf32>
    %41 = vector.broadcast %0 : vector<1x256xf32> to vector<16x256xf32>
    %42 = arith.addf %40, %41 : vector<16x256xf32>
    %43 = vector.extract_strided_slice %42 {offsets = [0, 0], sizes = [16, 128], strides = [1, 1]} : vector<16x256xf32> to vector<16x128xf32>
    %44 = math.tanh %43 : vector<16x128xf32>
    %45 = vector.extract_strided_slice %42 {offsets = [0, 128], sizes = [16, 128], strides = [1, 1]} : vector<16x256xf32> to vector<16x128xf32>
    %46 = arith.negf %45 : vector<16x128xf32>
    %47 = math.exp %46 : vector<16x128xf32>
    %cst_31 = arith.constant 1.000000e+00 : f32
    %48 = vector.broadcast %cst_31 : f32 to vector<16x128xf32>
    %49 = arith.addf %48, %47 : vector<16x128xf32>
    %50 = arith.divf %48, %49 : vector<16x128xf32>
    %51 = arith.mulf %44, %50 : vector<16x128xf32>
    %cst_32 = arith.constant 0.000000e+00 : f32
    %52 = vector.broadcast %cst_32 : f32 to vector<8x128xf32>
    %c1_33 = arith.constant 1 : index
    %c0_34 = arith.constant 0 : index
    %c0_35 = arith.constant 0 : index
    %53 = vector.load %arg5[%c1_33, %c0_34, %c0_35] : memref<2x24x128xf32, #tpu.memory_space<vmem>>, vector<1x8x128xf32>
    %54 = vector.shape_cast %53 : vector<1x8x128xf32> to vector<8x128xf32>
    %55 = vector.shape_cast %52 : vector<8x128xf32> to vector<1x8x128xf32>
    tpu.vector_store %arg5[%c1_33, %c0_34, %c0_35], %55 {strides = array<i32>} : memref<2x24x128xf32, #tpu.memory_space<vmem>>, vector<1x8x128xf32>,
    %c1_36 = arith.constant 1 : index
    %c8_37 = arith.constant 8 : index
    %c0_38 = arith.constant 0 : index
    %56 = vector.load %arg5[%c1_36, %c8_37, %c0_38] : memref<2x24x128xf32, #tpu.memory_space<vmem>>, vector<1x16x128xf32>
    %57 = vector.shape_cast %56 : vector<1x16x128xf32> to vector<16x128xf32>
    %58 = vector.shape_cast %51 : vector<16x128xf32> to vector<1x16x128xf32>
    tpu.vector_store %arg5[%c1_36, %c8_37, %c0_38], %58 {strides = array<i32>} : memref<2x24x128xf32, #tpu.memory_space<vmem>>, vector<1x16x128xf32>,
    return
  }
  func.func @transform_0(%arg0: i32) -> (i32, i32, i32) {
    %c0_i32 = arith.constant 0 : i32
    %c0_i32_0 = arith.constant 0 : i32
    %c0_i32_1 = arith.constant 0 : i32
    return %arg0, %c0_i32, %c0_i32_0 : i32, i32, i32
  }
  func.func @transform_1(%arg0: i32) -> (i32, i32) {
    %c0_i32 = arith.constant 0 : i32
    %c0_i32_0 = arith.constant 0 : i32
    %c0_i32_1 = arith.constant 0 : i32
    return %c0_i32, %c0_i32_0 : i32, i32
  }
  func.func @transform_2(%arg0: i32) -> (i32, i32) {
    %c0_i32 = arith.constant 0 : i32
    %c0_i32_0 = arith.constant 0 : i32
    %c0_i32_1 = arith.constant 0 : i32
    return %c0_i32, %c0_i32_0 : i32, i32
  }
  func.func @transform_3(%arg0: i32) -> (i32, i32) {
    %c0_i32 = arith.constant 0 : i32
    %c0_i32_0 = arith.constant 0 : i32
    %c0_i32_1 = arith.constant 0 : i32
    return %c0_i32, %c0_i32_0 : i32, i32
  }
  func.func @transform_4(%arg0: i32) -> (i32, i32, i32) {
    %c0_i32 = arith.constant 0 : i32
    %c0_i32_0 = arith.constant 0 : i32
    %c0_i32_1 = arith.constant 0 : i32
    return %arg0, %c0_i32, %c0_i32_0 : i32, i32, i32
  }
}

</mosaic_0001>

<bundles_post_ra>
// kernel: tpu_custom_call.1
= control target key start
LH: loop header
LB: loop body
LE: loop exit
PB: predicated region body
PF: predicated region fallthrough
CT: control target
= control target key end

     0   :  { %9 = vsyncpa [#allocation3], 0  ;;  %s1588_s0 = inlined_call_operand.hbm [shape: f32[4,24,128], index: 0, kind: input, shape index: {}]   ;;  %s1589_s1 = inlined_call_operand.hbm [shape: f32[128,256], index: 1, kind: input, shape index: {}]   ;;  %s1590_s2 = inlined_call_operand.hbm [shape: f32[128,256], index: 2, kind: input, shape index: {}]   ;;  %s1591_s3 = inlined_call_operand.vmem [shape: f32[1,256], index: 3, kind: input, shape index: {}]   ;;  %s1592_s4 = inlined_call_operand.hbm [shape: f32[4,24,128], index: 4, kind: output, shape index: {}]  }
   0x1   :  { %11 = vsyncpa [#allocation3 + $0x1], 0 }
   0x2   :  { %12 = vsyncpa [#allocation6], 0 }
   0x3   :  { %13 = vsyncpa [#allocation4], 0 }
   0x4   :  { %15 = vsyncpa [#allocation4 + $0x1], 0  ;;  %s1318_s15 = smov 0   ;;  %s1320_s16 = smov 0  }
   0x5   :  { %s1322_s17 = smov 0   ;;  %s1324_s18 = smov 0  }
   0x6 LB: > { %s1339_s19 = sadd.s32 4294967295, %s1280_s18   ;;  %s859_s20 = sadd.s32 4294967294, %s1280_s18   ;;  %s1280_s18 = sphi %s1324_s18, %s1612_s18   ;;  %s1276_s17 = sphi %s1322_s17, %s1611_s17   ;;  %s1272_s16 = sphi %s1320_s16, %s1610_s16   ;;  %s1268_s15 = sphi %s1318_s15, %s1609_s15  }
   0x7   : > { %p41_p0 = scmp.ne.s32.totalorder %s1272_s16, %s1268_s15  ;;  %p1593_p1 = scmp.eq.s32.totalorder %s1339_s19, 0 }
   0x8   : > { %p134_p3 = scmp.eq.s32.totalorder %s859_s20, 1  ;;  %p860_p5 = scmp.ge.s32.totalorder %s1280_s18, 1 }
   0x9   : > { %p1348_p4 = por %p1593_p1, %p41_p0  ;;  %p141_p7 = scmp.lt.s32.totalorder %s1280_s18, 3 }
   0xa   : > { %p1353_p6 = por %p134_p3, %p41_p0  ;;  %s1282_s24 = smov [#allocation5]  }
   0xb   : > { %s1596_s21 = scalar_select %p1348_p4, 1, 0 }
   0xc   : > { %s1597_s22 = scalar_select %p1353_p6, 1, 0 }
   0xd   : > { %p1358_p8 = pnand %p860_p5, %p141_p7  ;;  %s153_s25 = sshll.u32 %s1282_s24, 4  ;;  %s1362_s25 = int_to_ptr.vmem [resolvable:$true] %s153_s25 }
   0xe   : > { %s1283_s27 = smov [#allocation7]   ;;  %s1124_s5 = scalar_lea.hbm %s1589_s1, 4096 }
   0xf   : > { %p1038_p9 = pneg %p1358_p8  ;;  %s166_s28 = sshll.u32 %s1283_s27, 4  ;;  %s1373_s28 = int_to_ptr.vmem [resolvable:$true] %s166_s28 }
  0x10   : > { %p1125_p12 = scmp.ne.s32.totalorder %s1589_s1, %s1124_s5  ;;  %p1131_p5 = scmp.lt.u32.totalorder %s1124_s5, %s1589_s1 }
  0x11   : > { %p1369_p11 = pnand %p1038_p9, %p1593_p1 }
  0x13   : > { %p1126_p13 = pneg %p1369_p11 }
  0x15   : > { %p1127_p0 = pnand %p1126_p13, %p1125_p12 }
  0x17   : > { %p1128_p3 = pneg %p1127_p0 }
  0x19   : > { %p1133_p7 = pnand %p1131_p5, %p1128_p3 }
  0x1b   : > { %1136 = shalt.err (!%p1133_p7)
}
  0x1c   : > { %s1137_s10 = scalar_lea.vmem %s1362_s25, 4096  ;;  %p1145_p2 = scmp.lt.s32.totalorder %s1362_s25, %s1362_s25 }
  0x1d   : > { %p1138_p9 = scmp.ne.s32.totalorder %s1362_s25, %s1137_s10  ;;  %p1146_p12 = scmp.lt.s32.totalorder %s1137_s10, %s1137_s10 }
  0x1f   : > { %p1140_p10 = pnand %p1138_p9, %p1126_p13  ;;  %p1147_p0 = por %p1146_p12, %p1145_p2 }
  0x21   : > { %p1141_p1 = pneg %p1140_p10 }
  0x23   : > { %p1148_p6 = pnand %p1147_p0, %p1141_p1 }
  0x25   : > { %1151 = shalt.err (!%p1148_p6)
}
  0x26   : > { %s1284_s11 = smov 256   ;;  %s1285_s12 = smov 16  }
  0x27   : > { %1041 = dma.hbm_to_vmem [thread:$0]  (!%p1369_p11), %s1589_s1, 4096, %s1362_s25, [#allocation6], %s1284_s11, %s1284_s11, %s1285_s12  }
  0x28   : > { %s1152_s27 = scalar_lea.hbm %s1590_s2, 4096 }
  0x29   : > { %p1153_p2 = scmp.ne.s32.totalorder %s1590_s2, %s1152_s27  ;;  %p1159_p10 = scmp.lt.u32.totalorder %s1152_s27, %s1590_s2 }
  0x2b   : > { %p1155_p1 = pnand %p1153_p2, %p1126_p13 }
  0x2d   : > { %p1156_p6 = pneg %p1155_p1 }
  0x2f   : > { %p1161_p3 = pnand %p1159_p10, %p1156_p6 }
  0x31   : > { %1164 = shalt.err (!%p1161_p3)
}
  0x32   : > { %s1165_s25 = scalar_lea.vmem %s1373_s28, 4096  ;;  %p1173_p12 = scmp.lt.s32.totalorder %s1373_s28, %s1373_s28 }
  0x33   : > { %p1166_p5 = scmp.ne.s32.totalorder %s1373_s28, %s1165_s25  ;;  %p1174_p0 = scmp.lt.s32.totalorder %s1165_s25, %s1165_s25 }
  0x35   : > { %p1168_p7 = pnand %p1166_p5, %p1126_p13  ;;  %p1175_p2 = por %p1174_p0, %p1173_p12 }
  0x37   : > { %p1169_p9 = pneg %p1168_p7 }
  0x39   : > { %p1176_p1 = pnand %p1175_p2, %p1169_p9 }
  0x3b   : > { %1179 = shalt.err (!%p1176_p1)
}
  0x3c   : > { %1044 = dma.hbm_to_vmem [thread:$0]  (!%p1369_p11), %s1590_s2, 4096, %s1373_s28, [#allocation6], %s1284_s11, %s1284_s11, %s1285_s12  }
  0x3d   : > { %s1428_s9 = sadd.s32 1, %s1280_s18   ;;  %s28_s26 = sadd.s32 1, %s1276_s17 }
  0x3e   : > { %s25_s10 = ssub.s32 %s1280_s18, %s1428_s9  ;;  %p35_p13 = scmp.ne.s32.totalorder %s1276_s17, %s1272_s16 }
  0x3f   : > { %p26_p6 = scmp.eq.s32.totalorder %s25_s10, 0  ;;  %p36_p10 = scmp.eq.s32.totalorder %s1280_s18, 0 }
  0x40   : > { %p1600_p3 = scmp.eq.s32.totalorder %s1339_s19, 1  ;;  %p1055_p7 = scmp.lt.s32.totalorder %s1280_s18, 2 }
  0x41   : > { %s1444_s14 = scalar_select %p26_p6, %s1276_s17, %s28_s26  }
  0x42   : > { %p1438_p5 = por %p1600_p3, %p35_p13  ;;  %p37_p9 = por %p36_p10, %p35_p13 }
  0x43   : > { %s183_s20 = sand.u32 1, %s1276_s17   ;;  %s1023_s28 = smul.u32 768, %s1280_s18 }
  0x44   : > { %s1601_s13 = scalar_select %p1438_p5, 1, 0 }
  0x45   : > { %s1022_s24 = smul.u32 48, %s183_s20  ;;  %p1448_p11 = pnand %p1055_p7, %p37_p9 }
  0x46   : > { %s1455_s29 = scalar_lea.hbm %s1588_s0, %s1023_s28  ;;  %s1459_s6 = scalar_lea.sflag [#allocation3], %s183_s20 }
  0x47   : > { %s187_s30 = scalar_lea.vmem [#allocation2], %s1022_s24  ;;  %s1180_s25 = scalar_lea.hbm %s1455_s29, 768 }
  0x48   : > { %s195_s5 = sshll.u32 %s187_s30, 4  ;;  %p1181_p12 = scmp.ne.s32.totalorder %s1455_s29, %s1180_s25  ;;  %s1457_s5 = int_to_ptr.vmem [resolvable:$true] %s195_s5 }
  0x49   : > { %p1182_p0 = pneg %p1448_p11  ;;  %s1185_s26 = scalar_lea.hbm %s1588_s0, 1536 }
  0x4a   : > { %p1186_p13 = scmp.lt.u32.totalorder %s1455_s29, %s1588_s0  ;;  %p1187_p6 = scmp.lt.u32.totalorder %s1185_s26, %s1180_s25 }
  0x4b   : > { %p1183_p2 = pnand %p1182_p0, %p1181_p12  ;;  %p1189_p3 = scmp.lt.u32.totalorder %s1180_s25, %s1455_s29 }
  0x4c   : > { %p1188_p10 = por %p1187_p6, %p1186_p13 }
  0x4d   : > { %p1184_p1 = pneg %p1183_p2 }
  0x4e   : > { %p1190_p7 = por %p1189_p3, %p1188_p10 }
  0x50   : > { %p1191_p9 = pnand %p1190_p7, %p1184_p1 }
  0x52   : > { %1194 = shalt.err (!%p1191_p9)
}
  0x53   : > { %s1195_s20 = scalar_lea.vmem %s1457_s5, 768  ;;  %s1286_s24 = smov [#allocation2]  }
  0x54   : > { %p1196_p12 = scmp.ne.s32.totalorder %s1457_s5, %s1195_s20  ;;  %s1200_s12 = sshll.u32 %s1286_s24, 4  ;;  %s1201_s12 = int_to_ptr.vmem [resolvable:$false] %s1200_s12 }
  0x55   : > { %s1202_s27 = scalar_lea.vmem %s1201_s12, 1536  ;;  %p1203_p4 = scmp.lt.s32.totalorder %s1457_s5, %s1201_s12 }
  0x56   : > { %p1198_p2 = pnand %p1196_p12, %p1182_p0  ;;  %p1204_p13 = scmp.lt.s32.totalorder %s1202_s27, %s1195_s20 }
  0x58   : > { %p1199_p5 = pneg %p1198_p2  ;;  %p1205_p6 = por %p1204_p13, %p1203_p4 }
  0x5a   : > { %p1206_p10 = pnand %p1205_p6, %p1199_p5 }
  0x5c   : > { %1209 = shalt.err (!%p1206_p10)
}
  0x5d   : > { %s1287_s30 = smov 128   ;;  %s1288_s25 = smov 8  }
  0x5e   : > { %1048 = dma.hbm_to_vmem [thread:$0]  (!%p1448_p11), %s1455_s29, 768, %s1457_s5, %s1459_s6, %s1287_s30, %s1287_s30, %s1288_s25  }
  0x5f   : > { %207 = sbr.rel (%p1358_p8) target bundleno = 436 (0x1b4), region = 36  ;;  %s1490_s7 = sand.u32 (!%p1358_p8), 1, %s1272_s16  }
  0x60   : > { %s1024_s8 = smul.u32 (!%p1358_p8), 48, %s1490_s7  ;;  %s210_s26 = scalar_lea.sflag (!%p1358_p8), [#allocation3], %s1490_s7 }
  0x61   : > { %p1603_p4 = scmp.ne.s32.totalorder (!%p1358_p8), %s1596_s21, 0 }
  0x62   : > { %s1496_s10 = scalar_lea.vmem (!%p1358_p8), [#allocation2], %s1024_s8 }
  0x66   : > { %1255 = dma.done.wait (%p1603_p4), %s210_s26, 768  }
  0x67   : > { %1257 = vsyncadd (%p1603_p4), %s210_s26, 4294966528  ;;  %p1604_p5 = scmp.eq.s32.totalorder %s1339_s19, 0 }
  0x69   : > { %1259 = dma.done.wait (%p1604_p5), [#allocation6], 8192   ;;  %p1605_p8 = pmov %p1604_p5 }
  0x6a   : > { %v1289_v0 = vmov 0.0   ;;  %v286_v1 = vld [vmem:[#allocation7 + $0x8] sm:$0xff]  ;;  %v288_v2 = vld [vmem:[#allocation7 + $0x18] sm:$0xff]  ;;  %v285_v3 = vld [vmem:[#allocation7] sm:$0xff]  ;;  %s1524_s21 = scalar_lea.vmem [#allocation8], %s1024_s8  ;;  %s1025_s29 = smul.u32 768, %s1339_s19 }
  0x6b   : > { %1261 = vsyncadd (%p1605_p8), [#allocation6], 4294959104  ;;  %381 = vmatprep.mubr.f32.mxu0 %v1289_v0  ;;  %638 = vmatprep.mubr.f32.mxu1 %v1289_v0  ;;  %v886_v4 = vpack.c.bf16 %v288_v2, %v286_v1  ;;  %v287_v5 = vld [vmem:[#allocation7 + $0x10] sm:$0xff]  ;;  %v290_v6 = vld [vmem:[#allocation7 + $0x28] sm:$0xff]  ;;  %502 = vst [vmem:[%s1524_s21] sm:$0xff] %v1289_v0  ;;  %s767_s5 = sshll.u32 %s1524_s21, 4  ;;  %s753_s19 = scalar_lea.sflag [#allocation4], %s1490_s7  ;;  %s1542_s5 = int_to_ptr.vmem [resolvable:$true] %s767_s5 }
  0x6c   : > { %v292_v7 = vld [vmem:[#allocation7 + $0x38] sm:$0xff]  ;;  %v888_v8 = vpack.c.bf16 %v287_v5, %v285_v3  ;;  %v289_v10 = vld [vmem:[#allocation7 + $0x20] sm:$0xff]  ;;  %v291_v11 = vld [vmem:[#allocation7 + $0x30] sm:$0xff]  ;;  %878 = vst [vmem:[%s1524_s21 + $0x18] sm:$0xff] %v1289_v0  ;;  %s1540_s20 = scalar_lea.hbm %s1592_s4, %s1025_s29  ;;  %s1210_s24 = scalar_lea.vmem %s1542_s5, 768 }
  0x6d   : > { %v890_v9 = vpack.c.bf16 %v292_v7, %v290_v6  ;;  %v294_v12 = vld [vmem:[#allocation7 + $0x48] sm:$0xff]  ;;  %887 = vmatprep.subr.bf16.mxu0 %v886_v4  ;;  %951 = vmatprep.subr.bf16.mxu1 %v886_v4  ;;  %v296_v13 = vld [vmem:[#allocation7 + $0x58] sm:$0xff]  ;;  %v892_v14 = vpack.c.bf16 %v291_v11, %v289_v10  ;;  %v293_v16 = vld [vmem:[#allocation7 + $0x40] sm:$0xff]  ;;  %p1211_p11 = scmp.ne.s32.totalorder %s1542_s5, %s1210_s24  ;;  %p1606_p0 = scmp.ne.s32.totalorder %s1601_s13, 0 }
  0x6e   : > { %889 = vmatpush1.bf16.msra.mxu0 %v888_v8  ;;  %953 = vmatpush1.bf16.msra.mxu1 %v888_v8  ;;  %v894_v15 = vpack.c.bf16 %v296_v13, %v294_v12  ;;  %v295_v17 = vld [vmem:[#allocation7 + $0x50] sm:$0xff]  ;;  %v298_v18 = vld [vmem:[#allocation7 + $0x68] sm:$0xff]  ;;  %v300_v19 = vld [vmem:[#allocation7 + $0x78] sm:$0xff]  ;;  %s1290_s12 = smov [#allocation8]  }
  0x6f   : > { %891 = vmatprep.subr.bf16.mxu0 %v890_v9  ;;  %955 = vmatprep.subr.bf16.mxu1 %v890_v9  ;;  %v896_v20 = vpack.c.bf16 %v295_v17, %v293_v16  ;;  %v898_v21 = vpack.c.bf16 %v300_v19, %v298_v18  ;;  %v297_v22 = vld [vmem:[#allocation7 + $0x60] sm:$0xff]  ;;  %v299_v23 = vld [vmem:[#allocation7 + $0x70] sm:$0xff]  ;;  %v302_v24 = vld [vmem:[#allocation7 + $0x88] sm:$0xff]  ;;  %p1212_p1 = pnand %p1211_p11, %p1606_p0  ;;  %s1214_s27 = sshll.u32 %s1290_s12, 4  ;;  %s1215_s27 = int_to_ptr.vmem [resolvable:$false] %s1214_s27 }
  0x70   : > { %v304_v25 = vld [vmem:[#allocation7 + $0x98] sm:$0xff]  ;;  %v900_v26 = vpack.c.bf16 %v299_v23, %v297_v22  ;;  %v301_v28 = vld [vmem:[#allocation7 + $0x80] sm:$0xff]  ;;  %v303_v29 = vld [vmem:[#allocation7 + $0x90] sm:$0xff]  ;;  %s1216_s30 = scalar_lea.vmem %s1215_s27, 1536  ;;  %p1217_p7 = scmp.lt.s32.totalorder %s1542_s5, %s1215_s27 }
  0x71   : > { %v902_v27 = vpack.c.bf16 %v304_v25, %v302_v24  ;;  %v306_v30 = vld [vmem:[#allocation7 + $0xa8] sm:$0xff]  ;;  %v308_v31 = vld [vmem:[#allocation7 + $0xb8] sm:$0xff]  ;;  %v904_v32 = vpack.c.bf16 %v303_v29, %v301_v28  ;;  %v305_v34 = vld [vmem:[#allocation7 + $0xa0] sm:$0xff]  ;;  %p1213_p3 = pneg %p1212_p1  ;;  %p1218_p9 = scmp.lt.s32.totalorder %s1216_s30, %s1210_s24 }
  0x72   : > { %893 = vmatpush1.bf16.msra.mxu0 %v892_v14  ;;  %957 = vmatpush1.bf16.msra.mxu1 %v892_v14  ;;  %v906_v33 = vpack.c.bf16 %v308_v31, %v306_v30  ;;  %v307_v35 = vld [vmem:[#allocation7 + $0xb0] sm:$0xff]  ;;  %v310_v36 = vld [vmem:[#allocation7 + $0xc8] sm:$0xff]  ;;  %v312_v37 = vld [vmem:[#allocation7 + $0xd8] sm:$0xff] }
  0x73   : > { %895 = vmatprep.subr.bf16.mxu0 %v894_v15  ;;  %959 = vmatprep.subr.bf16.mxu1 %v894_v15  ;;  %v908_v38 = vpack.c.bf16 %v307_v35, %v305_v34  ;;  %v910_v39 = vpack.c.bf16 %v312_v37, %v310_v36  ;;  %v309_v40 = vld [vmem:[#allocation7 + $0xc0] sm:$0xff]  ;;  %v311_v41 = vld [vmem:[#allocation7 + $0xd0] sm:$0xff]  ;;  %v314_v42 = vld [vmem:[#allocation7 + $0xe8] sm:$0xff]  ;;  %p1219_p12 = por %p1218_p9, %p1217_p7 }
  0x74   : > { %v316_v43 = vld [vmem:[#allocation7 + $0xf8] sm:$0xff]  ;;  %v912_v44 = vpack.c.bf16 %v311_v41, %v309_v40  ;;  %v313_v46 = vld [vmem:[#allocation7 + $0xe0] sm:$0xff]  ;;  %v315_v47 = vld [vmem:[#allocation7 + $0xf0] sm:$0xff] }
  0x75   : > { %v914_v45 = vpack.c.bf16 %v316_v43, %v314_v42  ;;  %v254_v48 = vld [vmem:[#allocation5 + $0x8] sm:$0xff]  ;;  %v256_v49 = vld [vmem:[#allocation5 + $0x18] sm:$0xff]  ;;  %v916_v50 = vpack.c.bf16 %v315_v47, %v313_v46  ;;  %v253_v52 = vld [vmem:[#allocation5] sm:$0xff]  ;;  %v472_v42 = vlaneseq  ;;  %p1220_p2 = pnand %p1219_p12, %p1213_p3 }
  0x76   : > { %897 = vmatpush1.bf16.msra.mxu0 %v896_v20  ;;  %961 = vmatpush1.bf16.msra.mxu1 %v896_v20  ;;  %v918_v51 = vpack.c.bf16 %v256_v49, %v254_v48  ;;  %v255_v53 = vld [vmem:[#allocation5 + $0x10] sm:$0xff]  ;;  %v258_v54 = vld [vmem:[#allocation5 + $0x28] sm:$0xff]  ;;  %v260_v55 = vld [vmem:[#allocation5 + $0x38] sm:$0xff] }
  0x77   : > { %899 = vmatprep.subr.bf16.mxu0 %v898_v21  ;;  %963 = vmatprep.subr.bf16.mxu1 %v898_v21  ;;  %v249_v56 = vld [vmem:[%s1496_s10 + $0x8] sm:$0xff]  ;;  %v920_v57 = vpack.c.bf16 %v255_v53, %v253_v52  ;;  %v872_v58 = vld [vmem:[%s1496_s10 + $0x20] sm:$0xff]  ;;  %v922_v59 = vpack.c.bf16 %v260_v55, %v258_v54  ;;  %v250_v2 = vld [vmem:[%s1496_s10 + $0x10] sm:$0xff]  ;;  %v473_v43 = vshrl.u32 %v472_v42, 7 }
  0x78   : > { %v257_v60 = vld [vmem:[#allocation5 + $0x20] sm:$0xff]  ;;  %v259_v61 = vld [vmem:[#allocation5 + $0x30] sm:$0xff]  ;;  %v262_v62 = vld [vmem:[#allocation5 + $0x48] sm:$0xff] }
  0x79   : > { %v264_v63 = vld [vmem:[#allocation5 + $0x58] sm:$0xff]  ;;  %v924_v1 = vpack.c.bf16 %v259_v61, %v257_v60  ;;  %v261_v5 = vld [vmem:[#allocation5 + $0x40] sm:$0xff]  ;;  %v263_v6 = vld [vmem:[#allocation5 + $0x50] sm:$0xff] }
  0x7a   : > { %901 = vmatpush1.bf16.msra.mxu0 %v900_v26  ;;  %965 = vmatpush1.bf16.msra.mxu1 %v900_v26  ;;  %v873_v3 = vld [vmem:[%s1496_s10 + $0x28] sm:$0xff]  ;;  %v926_v4 = vpack.c.bf16 %v264_v63, %v262_v62  ;;  %v928_v9 = vpack.c.bf16 %v263_v6, %v261_v5  ;;  %v265_v11 = vld [vmem:[#allocation5 + $0x60] sm:$0xff]  ;;  %v267_v12 = vld [vmem:[#allocation5 + $0x70] sm:$0xff] }
  0x7b   : > { %903 = vmatprep.subr.bf16.mxu0 %v902_v27  ;;  %967 = vmatprep.subr.bf16.mxu1 %v902_v27  ;;  %v266_v7 = vld [vmem:[#allocation5 + $0x68] sm:$0xff]  ;;  %v268_v8 = vld [vmem:[#allocation5 + $0x78] sm:$0xff]  ;;  %v932_v15 = vpack.c.bf16 %v267_v12, %v265_v11  ;;  %v269_v17 = vld [vmem:[#allocation5 + $0x80] sm:$0xff] }
  0x7c   : > { %v930_v10 = vpack.c.bf16 %v268_v8, %v266_v7  ;;  %v270_v13 = vld [vmem:[#allocation5 + $0x88] sm:$0xff]  ;;  %v272_v14 = vld [vmem:[#allocation5 + $0x98] sm:$0xff]  ;;  %v271_v18 = vld [vmem:[#allocation5 + $0x90] sm:$0xff] }
  0x7d   : > { %v934_v16 = vpack.c.bf16 %v272_v14, %v270_v13  ;;  %v274_v19 = vld [vmem:[#allocation5 + $0xa8] sm:$0xff]  ;;  %v276_v20 = vld [vmem:[#allocation5 + $0xb8] sm:$0xff]  ;;  %v936_v21 = vpack.c.bf16 %v271_v18, %v269_v17  ;;  %v273_v23 = vld [vmem:[#allocation5 + $0xa0] sm:$0xff] }
  0x7e   : > { %905 = vmatpush1.bf16.msra.mxu0 %v904_v32  ;;  %969 = vmatpush1.bf16.msra.mxu1 %v904_v32  ;;  %v938_v22 = vpack.c.bf16 %v276_v20, %v274_v19  ;;  %v275_v24 = vld [vmem:[#allocation5 + $0xb0] sm:$0xff]  ;;  %v278_v25 = vld [vmem:[#allocation5 + $0xc8] sm:$0xff]  ;;  %v280_v26 = vld [vmem:[#allocation5 + $0xd8] sm:$0xff] }
  0x7f   : > { %907 = vmatprep.subr.bf16.mxu0 %v906_v33  ;;  %971 = vmatprep.subr.bf16.mxu1 %v906_v33  ;;  %v940_v27 = vpack.c.bf16 %v275_v24, %v273_v23  ;;  %v942_v28 = vpack.c.bf16 %v280_v26, %v278_v25  ;;  %v277_v29 = vld [vmem:[#allocation5 + $0xc0] sm:$0xff]  ;;  %v279_v30 = vld [vmem:[#allocation5 + $0xd0] sm:$0xff]  ;;  %v282_v31 = vld [vmem:[#allocation5 + $0xe8] sm:$0xff] }
  0x80   : > { %v284_v32 = vld [vmem:[#allocation5 + $0xf8] sm:$0xff]  ;;  %v944_v33 = vpack.c.bf16 %v279_v30, %v277_v29  ;;  %v281_v35 = vld [vmem:[#allocation5 + $0xe0] sm:$0xff]  ;;  %v283_v36 = vld [vmem:[#allocation5 + $0xf0] sm:$0xff] }
  0x81   : > { %v946_v34 = vpack.c.bf16 %v284_v32, %v282_v31  ;;  %v948_v37 = vpack.c.bf16 %v283_v36, %v281_v35  ;;  %v252_v40 = vld [vmem:[%s1496_s10 + $0xf] sm:$0xff]  ;;  %v875_v41 = vld [vmem:[%s1496_s10 + $0x27] sm:$0xff] }
  0x82   : > { %909 = vmatpush1.bf16.msra.mxu0 %v908_v38  ;;  %973 = vmatpush1.bf16.msra.mxu1 %v908_v38  ;;  %v251_v38 = vld [vmem:[%s1496_s10 + $0x7] sm:$0xff] }
  0x83   : > { %911 = vmatprep.subr.bf16.mxu0 %v910_v39  ;;  %975 = vmatprep.subr.bf16.mxu1 %v910_v39  ;;  %v874_v39 = vld [vmem:[%s1496_s10 + $0x1f] sm:$0xff] }
  0x86   : > { %913 = vmatpush1.bf16.msra.mxu0 %v912_v44  ;;  %977 = vmatpush1.bf16.msra.mxu1 %v912_v44  ;;  %v478_v44 = vsub.s32 1, %v473_v43 }
  0x87   : > { %915 = vmatprep.subr.bf16.mxu0 %v914_v45  ;;  %979 = vmatprep.subr.bf16.mxu1 %v914_v45  ;;  %v248_v45 = vld [vmem:[%s1591_s3] sm:$0x3] }
  0x88   : > { %v479_v46 = vrot.slane %v248_v45, %v478_v44 }
  0x8a   : > { %917 = vmatpush1.bf16.msra.mxu0 %v916_v50  ;;  %981 = vmatpush1.bf16.msra.mxu1 %v916_v50 }
  0x8b   : > { %919 = vmatprep.subr.bf16.mxu0 %v918_v51  ;;  %983 = vmatprep.subr.bf16.mxu1 %v918_v51 }
  0x8d   : > { %382 = vmatmul.mubr.f32.vlgmr.msra.gmra.mrb[0].mxu0 %v249_v56  ;;  %639 = vmatmul.mubr.f32.vlgmr.msra.gmra.mrb[0].mxu1 %v872_v58 }
  0x8e   : > { %921 = vmatpush1.bf16.msra.mxu0 %v920_v57  ;;  %985 = vmatpush1.bf16.msra.mxu1 %v920_v57  ;;  %v474_v57 = vsub.s32 0, %v473_v43 }
  0x8f   : > { %923 = vmatprep.subr.bf16.mxu0 %v922_v59  ;;  %987 = vmatprep.subr.bf16.mxu1 %v922_v59 }
  0x90   : > { %387 = vmatprep.mubr.f32.mxu0 %v1289_v0  ;;  %644 = vmatprep.mubr.f32.mxu1 %v1289_v0  ;;  %v475_v63 = vrot.slane %v248_v45, %v474_v57 }
  0x91   : > { %388 = vmatmul.mubr.f32.gmra.mrb[2].mxu0 %v250_v2  ;;  %645 = vmatmul.mubr.f32.gmra.mrb[2].mxu1 %v873_v3 }
  0x92   : > { %925 = vmatpush1.bf16.msra.mxu0 %v924_v1  ;;  %989 = vmatpush1.bf16.msra.mxu1 %v924_v1 }
  0x93   : > { %927 = vmatprep.subr.bf16.mxu0 %v926_v4  ;;  %991 = vmatprep.subr.bf16.mxu1 %v926_v4 }
  0x94   : > { %458 = vmatprep.mubr.f32.mxu0 %v1289_v0  ;;  %715 = vmatprep.mubr.f32.mxu1 %v1289_v0 }
  0x96   : > { %929 = vmatpush1.bf16.msra.mxu0 %v928_v9  ;;  %993 = vmatpush1.bf16.msra.mxu1 %v928_v9 }
  0x97   : > { %931 = vmatprep.subr.bf16.mxu0 %v930_v10  ;;  %995 = vmatprep.subr.bf16.mxu1 %v930_v10 }
  0x9a   : > { %933 = vmatpush1.bf16.msra.mxu0 %v932_v15  ;;  %997 = vmatpush1.bf16.msra.mxu1 %v932_v15 }
  0x9b   : > { %935 = vmatprep.subr.bf16.mxu0 %v934_v16  ;;  %999 = vmatprep.subr.bf16.mxu1 %v934_v16 }
  0x9e   : > { %937 = vmatpush1.bf16.msra.mxu0 %v936_v21  ;;  %1001 = vmatpush1.bf16.msra.mxu1 %v936_v21 }
  0x9f   : > { %939 = vmatprep.subr.bf16.mxu0 %v938_v22  ;;  %1003 = vmatprep.subr.bf16.mxu1 %v938_v22 }
  0xa2   : > { %941 = vmatpush1.bf16.msra.mxu0 %v940_v27  ;;  %1005 = vmatpush1.bf16.msra.mxu1 %v940_v27 }
  0xa3   : > { %943 = vmatprep.subr.bf16.mxu0 %v942_v28  ;;  %1007 = vmatprep.subr.bf16.mxu1 %v942_v28 }
  0xa6   : > { %945 = vmatpush1.bf16.msra.mxu0 %v944_v33  ;;  %1009 = vmatpush1.bf16.msra.mxu1 %v944_v33 }
  0xa7   : > { %947 = vmatprep.subr.bf16.mxu0 %v946_v34  ;;  %1011 = vmatprep.subr.bf16.mxu1 %v946_v34 }
  0xaa   : > { %949 = vmatpush1.bf16.msra.mxu0 %v948_v37  ;;  %1013 = vmatpush1.bf16.msra.mxu1 %v948_v37 }
  0xad   : > { %459 = vmatmul.mubr.f32.vlgmr.msra.gmra.mrb[0].mxu0 %v251_v38  ;;  %716 = vmatmul.mubr.f32.vlgmr.msra.gmra.mrb[0].mxu1 %v874_v39 }
  0xae   : > { %464 = vmatprep.mubr.f32.mxu0 %v1289_v0  ;;  %721 = vmatprep.mubr.f32.mxu1 %v1289_v0 }
  0xb1   : > { %465 = vmatmul.mubr.f32.gmra.mrb[2].mxu0 %v252_v40  ;;  %722 = vmatmul.mubr.f32.gmra.mrb[2].mxu1 %v875_v41 }
 0x180   : > { %v460_v47 = vpop.f32.mrb[0].mxu0  ;;  %v717_v48 = vpop.f32.mrb[0].mxu1 }
 0x181   : > { %v462_v49 = vpop.f32.mrb[1].mxu0  ;;  %v719_v50 = vpop.f32.mrb[1].mxu1  ;;  %v482_v1 = vadd.f32 %v475_v63, %v460_v47  ;;  %v728_v2 = vadd.f32 %v717_v48, %v475_v63 }
 0x182   : > { %v483_v51 = vadd.f32 %v479_v46, %v462_v49  ;;  %v729_v52 = vadd.f32 %v719_v50, %v479_v46 }
 0x184   : > { %v870_v53 = vmul.f32 -1.442695, %v483_v51  ;;  %v876_v54 = vmul.f32 -1.442695, %v729_v52  ;;  %v466_v55 = vpop.f32.mrb[2].mxu0  ;;  %v723_v56 = vpop.f32.mrb[2].mxu1 }
 0x185   : > { %v468_v0 = vpop.f32.mrb[3].mxu0  ;;  %v725_v58 = vpop.f32.mrb[3].mxu1  ;;  %v484_v6 = vadd.f32 %v475_v63, %v466_v55  ;;  %v730_v8 = vadd.f32 %v723_v56, %v475_v63 }
 0x186   : > { %1100 = vpow2.f32 %v870_v53  ;;  %v485_v59 = vadd.f32 %v479_v46, %v468_v0  ;;  %v731_v60 = vadd.f32 %v725_v58, %v479_v46 }
 0x187   : > { %1102 = vpow2.f32 %v876_v54 }
 0x188   : > { %v871_v61 = vmul.f32 -1.442695, %v485_v59  ;;  %v877_v62 = vmul.f32 -1.442695, %v731_v60 }
 0x18a   : > { %1104 = vpow2.f32 %v871_v61 }
 0x18b   : > { %1106 = vpow2.f32 %v877_v62 }
 0x18c   : > { %1108 = vtanh.f32 %v482_v1 }
 0x18d   : > { %1110 = vtanh.f32 %v728_v2 }
 0x190   : > { %v1101_v3 = vpop.eup %1100 }
 0x191   : > { %v1103_v4 = vpop.eup %1102  ;;  %v494_v5 = vadd.f32 1.0, %v1101_v3 }
 0x192   : > { %v740_v7 = vadd.f32 1.0, %v1103_v4 }
 0x193   : > { %1112 = vrcp.f32 %v494_v5 }
 0x194   : > { %v1105_v9 = vpop.eup %1104  ;;  %1114 = vrcp.f32 %v740_v7 }
 0x195   : > { %v1107_v10 = vpop.eup %1106  ;;  %1116 = vtanh.f32 %v484_v6  ;;  %v495_v11 = vadd.f32 1.0, %v1105_v9 }
 0x196   : > { %1118 = vtanh.f32 %v730_v8  ;;  %v741_v12 = vadd.f32 1.0, %v1107_v10  ;;  %v1109_v13 = vpop.eup %1108 }
 0x197   : > { %1120 = vrcp.f32 %v495_v11  ;;  %v1111_v14 = vpop.eup %1110 }
 0x198   : > { %1122 = vrcp.f32 %v741_v12 }
 0x19d   : > { %v1113_v15 = vpop.eup %1112 }
 0x19e   : > { %v1115_v16 = vpop.eup %1114  ;;  %v500_v17 = vmul.f32 %v1113_v15, %v1109_v13 }
 0x19f   : > { %v1117_v18 = vpop.eup %1116  ;;  %v746_v19 = vmul.f32 %v1115_v16, %v1111_v14 }
 0x1a0   : > { %v1119_v20 = vpop.eup %1118  ;;  %503 = vst [vmem:[%s1524_s21 + $0x8] sm:$0xff] %v500_v17 }
 0x1a1   : > { %v1121_v21 = vpop.eup %1120  ;;  %879 = vst [vmem:[%s1524_s21 + $0x20] sm:$0xff] %v746_v19 }
 0x1a2   : > { %v1123_v22 = vpop.eup %1122  ;;  %v501_v23 = vmul.f32 %v1121_v21, %v1117_v18 }
 0x1a3   : > { %v747_v24 = vmul.f32 %v1123_v22, %v1119_v20 }
 0x1a4   : > { %504 = vst [vmem:[%s1524_s21 + $0x10] sm:$0xff] %v501_v23 }
 0x1a5   : > { %880 = vst [vmem:[%s1524_s21 + $0x28] sm:$0xff] %v747_v24 }
 0x1a6   : > { %1223 = shalt.err (!%p1220_p2)
}
 0x1a7   : > { %s1224_s25 = scalar_lea.hbm %s1540_s20, 768  ;;  %s1228_s10 = scalar_lea.hbm %s1592_s4, 1536 }
 0x1a8   : > { %p1225_p13 = scmp.ne.s32.totalorder %s1540_s20, %s1224_s25  ;;  %p1229_p4 = scmp.lt.u32.totalorder %s1540_s20, %s1592_s4 }
 0x1a9   : > { %p1230_p5 = scmp.lt.u32.totalorder %s1228_s10, %s1224_s25  ;;  %p1232_p11 = scmp.lt.u32.totalorder %s1224_s25, %s1540_s20 }
 0x1aa   : > { %p1226_p6 = pnand %p1225_p13, %p1606_p0 }
 0x1ab   : > { %p1231_p8 = por %p1230_p5, %p1229_p4 }
 0x1ac   : > { %p1227_p10 = pneg %p1226_p6 }
 0x1ad   : > { %p1233_p1 = por %p1232_p11, %p1231_p8 }
 0x1af   : > { %p1234_p3 = pnand %p1233_p1, %p1227_p10 }
 0x1b1   : > { %1237 = shalt.err (!%p1234_p3)
}
 0x1b2   : > { %s1291_s11 = smov 128   ;;  %s1292_s29 = smov 8  }
 0x1b3   : > { %1036 = dma.vmem_to_hbm [thread:$0]  (%p1606_p0), %s1542_s5, 768, %s1540_s20, %s753_s19, %s1291_s11, %s1291_s11, %s1292_s29  }
 0x1b4 PF: > { %s782_s6 = sand.u32 1, %s1268_s15   ;;  %p1607_p7 = scmp.ne.s32.totalorder %s1597_s22, 0 }
 0x1b5   : > { %p1608_p9 = scmp.ge.s32.totalorder %s1280_s18, 2  ;;  %s783_s28 = scalar_lea.sflag [#allocation4], %s782_s6 }
 0x1b7   : > { %p1050_p12 = pnand %p1608_p9, %p1607_p7 }
 0x1b9   : > { %1263 = dma.done.wait (!%p1050_p12), %s783_s28, 768  }
 0x1ba   : > { %1265 = vsyncadd (!%p1050_p12), %s783_s28, 4294966528  ;;  %p18_p2 = scmp.ge.s32.totalorder %s1428_s9, 4   ;;  %s1609_s15 = smov %s1272_s16 }
 0x1bb   : > { %s1610_s16 = smov %s1276_s17  ;;  %s1611_s17 = smov %s1444_s14 }
 0x1bc   : > { %s1612_s18 = smov %s1428_s9  ;;  %20 = sbr.rel (!%p18_p2) target bundleno = 6 (0x6), region = 91 }
 0x1c3   :  { %788 = vsyncpa [#allocation3], 1 }
 0x1c4   :  { %790 = vsyncpa [#allocation3 + $0x1], 1 }
 0x1c5   :  { %791 = vsyncpa [#allocation6], 1 }
 0x1c6   :  { %792 = vsyncpa [#allocation4], 1 }
 0x1c7   :  { %794 = vsyncpa [#allocation4 + $0x1], 1 }

</bundles_post_ra>
